<compile_context>
chip_gen: v5e
topology: v5e:2x2
jax: 0.10.0
libtpu: 0.0.40
codegen_flags: <defaults>
</compile_context>

<pallas_src>
import jax
import jax.numpy as jnp
from jax.experimental import pallas as pl
from jax.experimental.pallas import tpu as pltpu


def qnet_kernel(x_ref, w1_ref, b1_ref, w2_ref, b2_ref, o_ref):
    # x_ref:  (13, TM)  bf16   (feature-major batch tile)
    # w1_ref: (256, 13) bf16   (native PyTorch layout)
    # b1_ref: (256, 1)  f32
    # w2_ref: (3, 256)  bf16   (native PyTorch layout)
    # b2_ref: (3, 1)    f32
    # o_ref:  (3, TM)   f32    (lane-dense output)
    h = jnp.dot(w1_ref[...], x_ref[...],
                preferred_element_type=jnp.float32)          # (256, TM) f32
    h = jnp.maximum(h + b1_ref[...], 0.0)                    # bias+ReLU in f32 (VPU)
    hb = h.astype(jnp.bfloat16)                               # halve layer-2 operand
    out = jnp.dot(w2_ref[...], hb,
                  preferred_element_type=jnp.float32)        # (3, TM) f32
    o_ref[...] = (out + b2_ref[...]).astype(o_ref.dtype)


def prepare_params(w1, b1, w2, b2):
    """One-time layout/precision prep (outside the hot path).

    Weights stay in their native PyTorch layouts (w1: (256,13), w2: (3,256))
    and are cast to bf16 once; biases become f32 column vectors that broadcast
    along the lane (batch) axis inside the kernel.
    """
    return (jnp.asarray(w1, dtype=jnp.bfloat16),                # (256, 13)
            jnp.asarray(b1, dtype=jnp.float32).reshape(-1, 1),  # (256, 1)
            jnp.asarray(w2, dtype=jnp.bfloat16),                # (3, 256)
            jnp.asarray(b2, dtype=jnp.float32).reshape(-1, 1))  # (3, 1)


def _round_up(n, m):
    return ((n + m - 1) // m) * m


_TM_MAX = 4096  # bf16 feature-major tiles keep per-step VMEM in single-digit MiB.


def _choose_tile(B):
    """Pick the batch-tile width (lane dim) and grid length.

    Lane dim must be a multiple of 128 or equal to the full batch, so small
    batches use a single full-width block; larger batches use >=2 tiles of a
    128-multiple width (so v7x's two TensorCores both get grid steps)."""
    if B <= 256:
        return B, 1
    tm = min(_TM_MAX, _round_up(pl.cdiv(B, 2), 128))
    return tm, pl.cdiv(B, tm)


@jax.jit
def qnet_forward(x, params):
    """x: (B, 13) float32; params from prepare_params().  Returns (B, 3) f32."""
    w1b, b1, w2b, b2 = params
    B = x.shape[0]

    # Feature-major + bf16 cast (one fused XLA op); kernel tiles lane-dense.
    x_fm = x.astype(jnp.bfloat16).T                           # (13, B) bf16

    tm, grid = _choose_tile(B)

    out_fm = pl.pallas_call(
        qnet_kernel,
        out_shape=jax.ShapeDtypeStruct((3, B), jnp.float32),
        grid_spec=pltpu.PrefetchScalarGridSpec(
            num_scalar_prefetch=0,
            grid=(grid,),
            in_specs=[
                pl.BlockSpec((13, tm), lambda i: (0, i)),     # x tile (feature-major)
                pl.BlockSpec((256, 13), lambda i: (0, 0)),    # w1 (resident)
                pl.BlockSpec((256, 1), lambda i: (0, 0)),     # b1 (resident)
                pl.BlockSpec((3, 256), lambda i: (0, 0)),     # w2 (resident)
                pl.BlockSpec((3, 1), lambda i: (0, 0)),       # b2 (resident)
            ],
            out_specs=pl.BlockSpec((3, tm), lambda i: (0, i)),  # lane-dense output
        ),
        compiler_params=pltpu.CompilerParams(
            dimension_semantics=("parallel",),
            vmem_limit_bytes=32 * 1024 * 1024,
        ),
    )(x_fm, w1b, b1, w2b, b2)

    return out_fm.T                                           # (B, 3)


def init_params(key):
    """Deterministic init mirroring nn.Linear shapes (uniform +/- 1/sqrt(fan_in))."""
    k1, k2, k3, k4 = jax.random.split(key, 4)
    bound1 = 1.0 / jnp.sqrt(13.0)
    bound2 = 1.0 / jnp.sqrt(256.0)
    w1 = jax.random.uniform(k1, (256, 13), jnp.float32, -bound1, bound1)
    b1 = jax.random.uniform(k2, (256,), jnp.float32, -bound1, bound1)
    w2 = jax.random.uniform(k3, (3, 256), jnp.float32, -bound2, bound2)
    b2 = jax.random.uniform(k4, (3,), jnp.float32, -bound2, bound2)
    return w1, b1, w2, b2


if __name__ == "__main__":
    key = jax.random.PRNGKey(0)
    kx, kp, kx2 = jax.random.split(key, 3)
    w1, b1, w2, b2 = init_params(kp)
    params = prepare_params(w1, b1, w2, b2)  # one-time layout/precision prep

    def ref_bf16(xv):
        # Reference mirroring the kernel's precision (bf16 operands, f32 accum).
        xb = xv.astype(jnp.bfloat16)
        h = jnp.dot(xb, w1.T.astype(jnp.bfloat16),
                    preferred_element_type=jnp.float32) + b1
        h = jnp.maximum(h, 0.0)
        hb = h.astype(jnp.bfloat16)
        return jnp.dot(hb, w2.T.astype(jnp.bfloat16),
                       preferred_element_type=jnp.float32) + b2

    # Small batch: single full-width block (lane dim == full batch).
    B = 8
    x = jax.random.normal(kx, (B, 13), jnp.float32)
    out = jax.block_until_ready(qnet_forward(x, params))
    assert out.shape == (B, 3)
    assert out.dtype == jnp.float32
    assert jnp.allclose(out, ref_bf16(x), atol=1e-2, rtol=1e-2)

    # Mid batch, not a multiple of 128: 2-step parallel grid + masked tail block.
    B2 = 300
    x2 = jax.random.normal(kx2, (B2, 13), jnp.float32)
    out2 = jax.block_until_ready(qnet_forward(x2, params))
    assert out2.shape == (B2, 3)
    assert jnp.allclose(out2, ref_bf16(x2), atol=1e-2, rtol=1e-2)

    print("KERNEL_OK")
</pallas_src>

<mosaic_0001>
module attributes {stable_mosaic.version = 11 : i64} {
  func.func @qnet_kernel(%arg0: i32, %arg1: memref<13x8xbf16, #tpu.memory_space<vmem>>, %arg2: memref<256x13xbf16, #tpu.memory_space<vmem>>, %arg3: memref<256x1xf32, #tpu.memory_space<vmem>>, %arg4: memref<3x256xbf16, #tpu.memory_space<vmem>>, %arg5: memref<3x1xf32, #tpu.memory_space<vmem>>, %arg6: memref<3x8xf32, #tpu.memory_space<vmem>>) attributes {dimension_semantics = [#tpu.dimension_semantics<parallel>], iteration_bounds = array<i64: 1>, scalar_prefetch = 0 : i64, scratch_operands = 0 : i64, tpu.core_type = #tpu.core_type<tc>, window_params = [{transform_indices = @transform_0, window_bounds = array<i64: 13, 8>}, {pipeline_mode = #tpu.pipeline_mode<synchronous>, transform_indices = @transform_1, window_bounds = array<i64: 256, 13>}, {pipeline_mode = #tpu.pipeline_mode<synchronous>, transform_indices = @transform_2, window_bounds = array<i64: 256, 1>}, {pipeline_mode = #tpu.pipeline_mode<synchronous>, transform_indices = @transform_3, window_bounds = array<i64: 3, 256>}, {pipeline_mode = #tpu.pipeline_mode<synchronous>, transform_indices = @transform_4, window_bounds = array<i64: 3, 1>}, {transform_indices = @transform_5, window_bounds = array<i64: 3, 8>}]} {
    %c0 = arith.constant 0 : index
    %c0_0 = arith.constant 0 : index
    %0 = vector.load %arg2[%c0, %c0_0] : memref<256x13xbf16, #tpu.memory_space<vmem>>, vector<256x13xbf16>
    %c0_1 = arith.constant 0 : index
    %c0_2 = arith.constant 0 : index
    %1 = vector.load %arg1[%c0_1, %c0_2] : memref<13x8xbf16, #tpu.memory_space<vmem>>, vector<13x8xbf16>
    %cst = arith.constant dense<0.000000e+00> : vector<256x8xf32>
    %2 = tpu.matmul %0, %1, %cst {dimension_numbers = #tpu.dot_dimension_numbers<[1], [0], [0], [1], [0, 0, 1, 1], [], []>} : vector<256x13xbf16>, vector<13x8xbf16>, vector<256x8xf32> -> vector<256x8xf32>
    %c0_3 = arith.constant 0 : index
    %c0_4 = arith.constant 0 : index
    %3 = vector.load %arg3[%c0_3, %c0_4] : memref<256x1xf32, #tpu.memory_space<vmem>>, vector<256x1xf32>
    %4 = vector.broadcast %3 : vector<256x1xf32> to vector<256x8xf32>
    %5 = arith.addf %2, %4 : vector<256x8xf32>
    %cst_5 = arith.constant 0.000000e+00 : f32
    %6 = vector.broadcast %cst_5 : f32 to vector<256x8xf32>
    %7 = arith.maximumf %5, %6 : vector<256x8xf32>
    %8 = arith.truncf %7 : vector<256x8xf32> to vector<256x8xbf16>
    %c0_6 = arith.constant 0 : index
    %c0_7 = arith.constant 0 : index
    %9 = vector.load %arg4[%c0_6, %c0_7] : memref<3x256xbf16, #tpu.memory_space<vmem>>, vector<3x256xbf16>
    %cst_8 = arith.constant dense<0.000000e+00> : vector<3x8xf32>
    %10 = tpu.matmul %9, %8, %cst_8 {dimension_numbers = #tpu.dot_dimension_numbers<[1], [0], [0], [1], [0, 0, 1, 1], [], []>} : vector<3x256xbf16>, vector<256x8xbf16>, vector<3x8xf32> -> vector<3x8xf32>
    %c0_9 = arith.constant 0 : index
    %c0_10 = arith.constant 0 : index
    %11 = vector.load %arg5[%c0_9, %c0_10] : memref<3x1xf32, #tpu.memory_space<vmem>>, vector<3x1xf32>
    %12 = vector.broadcast %11 : vector<3x1xf32> to vector<3x8xf32>
    %13 = arith.addf %10, %12 : vector<3x8xf32>
    %c0_11 = arith.constant 0 : index
    %c0_12 = arith.constant 0 : index
    %14 = vector.load %arg6[%c0_11, %c0_12] : memref<3x8xf32, #tpu.memory_space<vmem>>, vector<3x8xf32>
    tpu.vector_store %arg6[%c0_11, %c0_12], %13 {strides = array<i32>} : memref<3x8xf32, #tpu.memory_space<vmem>>, vector<3x8xf32>,
    return
  }
  func.func @transform_0(%arg0: i32) -> (i32, i32) {
    %c0_i32 = arith.constant 0 : i32
    %c0_i32_0 = arith.constant 0 : i32
    return %c0_i32, %arg0 : i32, i32
  }
  func.func @transform_1(%arg0: i32) -> (i32, i32) {
    %c0_i32 = arith.constant 0 : i32
    %c0_i32_0 = arith.constant 0 : i32
    %c0_i32_1 = arith.constant 0 : i32
    return %c0_i32, %c0_i32_0 : i32, i32
  }
  func.func @transform_2(%arg0: i32) -> (i32, i32) {
    %c0_i32 = arith.constant 0 : i32
    %c0_i32_0 = arith.constant 0 : i32
    %c0_i32_1 = arith.constant 0 : i32
    return %c0_i32, %c0_i32_0 : i32, i32
  }
  func.func @transform_3(%arg0: i32) -> (i32, i32) {
    %c0_i32 = arith.constant 0 : i32
    %c0_i32_0 = arith.constant 0 : i32
    %c0_i32_1 = arith.constant 0 : i32
    return %c0_i32, %c0_i32_0 : i32, i32
  }
  func.func @transform_4(%arg0: i32) -> (i32, i32) {
    %c0_i32 = arith.constant 0 : i32
    %c0_i32_0 = arith.constant 0 : i32
    %c0_i32_1 = arith.constant 0 : i32
    return %c0_i32, %c0_i32_0 : i32, i32
  }
  func.func @transform_5(%arg0: i32) -> (i32, i32) {
    %c0_i32 = arith.constant 0 : i32
    %c0_i32_0 = arith.constant 0 : i32
    return %c0_i32, %arg0 : i32, i32
  }
}

</mosaic_0001>

<bundles_post_ra>
// kernel: qnet_forward.1
= control target key start
LH: loop header
LB: loop body
LE: loop exit
PB: predicated region body
PF: predicated region fallthrough
CT: control target
= control target key end

     0   :  { %vm382_vm0 = vcmask 1045504   ;;  %vm383_vm1 = vcmask 1046528   ;;  %v718_v3 = vmov 0   ;;  %v719_v7 = vmov 65535   ;;  %s1025_s0 = inlined_call_operand.vmem [shape: bf16[13,8], index: 0, kind: input, shape index: {}]   ;;  %s1026_s1 = inlined_call_operand.vmem [shape: bf16[256,13], index: 1, kind: input, shape index: {}]   ;;  %s1027_s2 = inlined_call_operand.vmem [shape: f32[256,1], index: 2, kind: input, shape index: {}]   ;;  %s1028_s3 = inlined_call_operand.vmem [shape: bf16[3,256], index: 3, kind: input, shape index: {}]   ;;  %s1029_s4 = inlined_call_operand.vmem [shape: f32[3,1], index: 4, kind: input, shape index: {}]   ;;  %s1030_s5 = inlined_call_operand.hbm [shape: f32[3,8], index: 5, kind: output, shape index: {}]  }
   0x1   :  { %v86_v0 = vld [vmem:[%s1027_s2 + $0xf0] sm:$0xff]  ;;  %v84_v1 = vld [vmem:[%s1027_s2 + $0xe0] sm:$0xff]  ;;  %691 = vset.pattern.permute.xlu2 %v718_v3  ;;  %690 = vset.pattern.permute.xlu1 %v718_v3  ;;  %v384_v8 = vsel %vm382_vm0, 4294967295, %v719_v7  ;;  %vm333_vm2 = vcmask 105472   ;;  %v678_v13 = vld [vmem:[%s1026_s1 + $0x58] sm:$0xff] }
   0x2   :  { %v70_v2 = vld [vmem:[%s1027_s2 + $0x70] sm:$0xff]  ;;  %v649_v4 = vld [vmem:[%s1025_s0] sm:$0xf]  ;;  %v683_v5 = vld [vmem:[%s1025_s0] sm:$0x70]  ;;  %689 = vset.pattern.permute.xlu0 %v718_v3  ;;  %230 = vperm.xlu1 %690, %v84_v1   ;;  %v385_v9 = vsel %vm383_vm1, %v384_v8, 0 }
   0x3   :  { %v650_v6 = vor.u32 %v683_v5, %v649_v4  ;;  %240 = vperm.xlu0 %689, %v86_v0   ;;  %160 = vperm.xlu2 %691, %v70_v2   ;;  %v667_v11 = vld [vmem:[%s1026_s1] sm:$0xff]  ;;  %v673_v12 = vld [vmem:[%s1026_s1 + $0x30] sm:$0xff]  ;;  %v85_v14 = vld [vmem:[%s1027_s2 + $0xe8] sm:$0xff] }
   0x4   :  { %v87_v15 = vld [vmem:[%s1027_s2 + $0xf8] sm:$0xff] }
   0x5   :  { %v387_v10 = vand.u32 %v650_v6, %v385_v9  ;;  %v71_v16 = vld [vmem:[%s1027_s2 + $0x78] sm:$0xff] }
   0x7   :  { %396 = vmatpush.bf16.msra.mxu0 %v387_v10  ;;  %684 = vmatpush.bf16.msra.mxu1 %v387_v10 }
   0x8   :  { %685 = vmatpush.bf16.msra.mxu3 %v387_v10 }
   0x9   :  { %10 = vsyncpa [#allocation3], 0  ;;  %v83_v17 = vld [vmem:[%s1027_s2 + $0xd8] sm:$0xff]  ;;  %v82_v18 = vld [vmem:[%s1027_s2 + $0xd0] sm:$0xff]  ;;  %s574_s18 = sshll.u32 %s1030_s5, 4  ;;  %vm565_vm3 = vcmask 59392   ;;  %s575_s18 = int_to_ptr.hbm [resolvable:$true] %s574_s18 }
   0xa   :  { %651 = vmatmul.msk.bf16.vlgmr.msra.gmra.mxu0 %vm333_vm2, %v667_v11  ;;  %657 = vmatmul.msk.bf16.vlgmr.msra.gmra.mxu1 %vm333_vm2, %v673_v12  ;;  %v68_v19 = vld [vmem:[%s1027_s2 + $0x60] sm:$0xff]  ;;  %v668_v20 = vld [vmem:[%s1026_s1 + $0x8] sm:$0xff]  ;;  %v674_v21 = vld [vmem:[%s1026_s1 + $0x38] sm:$0xff] }
   0xb   :  { %662 = vmatmul.msk.bf16.vlgmr.msra.gmra.mxu3 %vm333_vm2, %v678_v13  ;;  %235 = vperm.xlu1 %690, %v85_v14   ;;  %v679_v22 = vld [vmem:[%s1026_s1 + $0x60] sm:$0xff]  ;;  %v69_v24 = vld [vmem:[%s1027_s2 + $0x68] sm:$0xff]  ;;  %v67_v26 = vld [vmem:[%s1027_s2 + $0x58] sm:$0xff] }
   0xc   :  { %245 = vperm.xlu0 %689, %v87_v15   ;;  %165 = vperm.xlu2 %691, %v71_v16   ;;  %v80_v23 = vld [vmem:[%s1027_s2 + $0xc0] sm:$0xff]  ;;  %v81_v25 = vld [vmem:[%s1027_s2 + $0xc8] sm:$0xff]  ;;  %v78_v27 = vld [vmem:[%s1027_s2 + $0xb0] sm:$0xff] }
   0xd   :  { %v66_v28 = vld [vmem:[%s1027_s2 + $0x50] sm:$0xff]  ;;  %v675_v30 = vld [vmem:[%s1026_s1 + $0x40] sm:$0xff]  ;;  %v680_v31 = vld [vmem:[%s1026_s1 + $0x68] sm:$0xff] }
   0xe   :  { %v669_v29 = vld [vmem:[%s1026_s1 + $0x10] sm:$0xff]  ;;  %v64_v32 = vld [vmem:[%s1027_s2 + $0x40] sm:$0xff]  ;;  %v79_v33 = vld [vmem:[%s1027_s2 + $0xb8] sm:$0xff] }
   0xf   :  { %v65_v34 = vld [vmem:[%s1027_s2 + $0x48] sm:$0xff]  ;;  %v76_v36 = vld [vmem:[%s1027_s2 + $0xa0] sm:$0xff]  ;;  %v62_v37 = vld [vmem:[%s1027_s2 + $0x30] sm:$0xff] }
  0x10   :  { %v77_v35 = vld [vmem:[%s1027_s2 + $0xa8] sm:$0xff]  ;;  %v670_v38 = vld [vmem:[%s1026_s1 + $0x18] sm:$0xff]  ;;  %v681_v40 = vld [vmem:[%s1026_s1 + $0x70] sm:$0xff] }
  0x11   :  { %v676_v39 = vld [vmem:[%s1026_s1 + $0x48] sm:$0xff]  ;;  %v74_v41 = vld [vmem:[%s1027_s2 + $0x90] sm:$0xff]  ;;  %v63_v42 = vld [vmem:[%s1027_s2 + $0x38] sm:$0xff] }
  0x12   :  { %v75_v43 = vld [vmem:[%s1027_s2 + $0x98] sm:$0xff]  ;;  %v61_v44 = vld [vmem:[%s1027_s2 + $0x28] sm:$0xff]  ;;  %v72_v45 = vld [vmem:[%s1027_s2 + $0x80] sm:$0xff] }
  0x13   :  { %225 = vperm.xlu1 %690, %v83_v17   ;;  %v60_v46 = vld [vmem:[%s1027_s2 + $0x20] sm:$0xff]  ;;  %v677_v48 = vld [vmem:[%s1026_s1 + $0x50] sm:$0xff]  ;;  %v682_v49 = vld [vmem:[%s1026_s1 + $0x78] sm:$0xff] }
  0x14   :  { %220 = vperm.xlu0 %689, %v82_v18   ;;  %150 = vperm.xlu2 %691, %v68_v19   ;;  %v671_v47 = vld [vmem:[%s1026_s1 + $0x20] sm:$0xff]  ;;  %v58_v50 = vld [vmem:[%s1027_s2 + $0x10] sm:$0xff]  ;;  %v73_v51 = vld [vmem:[%s1027_s2 + $0x88] sm:$0xff] }
  0x15   :  { %v59_v52 = vld [vmem:[%s1027_s2 + $0x18] sm:$0xff]  ;;  %v57_v53 = vld [vmem:[%s1027_s2 + $0x8] sm:$0xff]  ;;  %v56_v54 = vld [vmem:[%s1027_s2] sm:$0xff] }
  0x16   :  { %v527_v55 = vld [vmem:[%s1029_s4] sm:$0x7]  ;;  %v672_v56 = vld [vmem:[%s1026_s1 + $0x28] sm:$0xff] }
  0x1a   :  { %652 = vmatmul.msk.bf16.gmra.mxu0 %vm333_vm2, %v668_v20  ;;  %658 = vmatmul.msk.bf16.gmra.mxu1 %vm333_vm2, %v674_v21 }
  0x1b   :  { %663 = vmatmul.msk.bf16.gmra.mxu3 %vm333_vm2, %v679_v22  ;;  %210 = vperm.xlu1 %690, %v80_v23  }
  0x1c   :  { %155 = vperm.xlu0 %689, %v69_v24   ;;  %215 = vperm.xlu2 %691, %v81_v25  }
  0x23   :  { %145 = vperm.xlu1 %690, %v67_v26  }
  0x24   :  { %200 = vperm.xlu2 %691, %v78_v27   ;;  %140 = vperm.xlu0 %689, %v66_v28  }
  0x2a   :  { %653 = vmatmul.msk.bf16.gmra.mxu0 %vm333_vm2, %v669_v29  ;;  %659 = vmatmul.msk.bf16.gmra.mxu1 %vm333_vm2, %v675_v30 }
  0x2b   :  { %664 = vmatmul.msk.bf16.gmra.mxu3 %vm333_vm2, %v680_v31  ;;  %130 = vperm.xlu1 %690, %v64_v32  }
  0x2c   :  { %205 = vperm.xlu0 %689, %v79_v33   ;;  %135 = vperm.xlu2 %691, %v65_v34  }
  0x33   :  { %195 = vperm.xlu1 %690, %v77_v35  }
  0x34   :  { %190 = vperm.xlu0 %689, %v76_v36   ;;  %120 = vperm.xlu2 %691, %v62_v37  }
  0x3a   :  { %654 = vmatmul.msk.bf16.gmra.mxu0 %vm333_vm2, %v670_v38  ;;  %660 = vmatmul.msk.bf16.gmra.mxu1 %vm333_vm2, %v676_v39 }
  0x3b   :  { %665 = vmatmul.msk.bf16.gmra.mxu3 %vm333_vm2, %v681_v40  ;;  %180 = vperm.xlu1 %690, %v74_v41  }
  0x3c   :  { %125 = vperm.xlu0 %689, %v63_v42   ;;  %185 = vperm.xlu2 %691, %v75_v43  }
  0x43   :  { %115 = vperm.xlu1 %690, %v61_v44  }
  0x44   :  { %170 = vperm.xlu2 %691, %v72_v45   ;;  %110 = vperm.xlu0 %689, %v60_v46  }
  0x4a   :  { %655 = vmatmul.msk.bf16.gmra.mxu0 %vm333_vm2, %v671_v47  ;;  %661 = vmatmul.msk.bf16.gmra.mxu1 %vm333_vm2, %v677_v48 }
  0x4b   :  { %666 = vmatmul.msk.bf16.gmra.mxu3 %vm333_vm2, %v682_v49  ;;  %100 = vperm.xlu1 %690, %v58_v50  }
  0x4c   :  { %175 = vperm.xlu0 %689, %v73_v51   ;;  %105 = vperm.xlu2 %691, %v59_v52  }
  0x53   :  { %95 = vperm.xlu1 %690, %v57_v53  }
  0x54   :  { %90 = vperm.xlu0 %689, %v56_v54   ;;  %530 = vperm.xlu2 %691, %v527_v55  }
  0x5a   :  { %656 = vmatmul.msk.bf16.gmra.mxu0 %vm333_vm2, %v672_v56 }
  0x5d   :  { %v161_v57 = vpop.permute.xlu2 %160 }
  0x66   :  { %v166_v58 = vpop.permute.xlu2 %165 }
  0x6e   :  { %v151_v59 = vpop.permute.xlu2 %150 }
  0x74   :  { %v920_v60 = vpop.permute.xlu1 %230 }
  0x75   :  { %v922_v61 = vpop.permute.xlu0 %240 }
  0x76   :  { %v924_v62 = vpop.permute.xlu2 %215 }
  0x7d   :  { %v926_v63 = vpop.permute.xlu1 %235 }
  0x7e   :  { %v928_v0 = vpop.permute.xlu0 %245  ;;  %v201_v2 = vpop.permute.xlu2 %200 }
  0x85   :  { %v930_v1 = vpop.permute.xlu1 %225 }
  0x86   :  { %v932_v3 = vpop.permute.xlu0 %220  ;;  %v938_v11 = vpop.permute.xlu2 %135 }
  0x87   :  { %v934_v4 = vpop.f32.mrf.mxu0  ;;  %v428_v5 = vpop.f32.mrf.mxu1 }
  0x88   :  { %v429_v25 = vadd.f32 %v428_v5, %v151_v59 }
  0x8a   :  { %v490_v34 = vmax.f32 %v429_v25, 0.0 }
  0x8d   :  { %v936_v6 = vpop.permute.xlu1 %210 }
  0x8e   :  { %v453_v7 = vpop.f32.mrf.mxu3  ;;  %v156_v8 = vpop.permute.xlu0 %155 }
  0x8f   :  { %v400_v9 = vpop.f32.mrf.mxu0  ;;  %v430_v10 = vpop.f32.mrf.mxu1  ;;  %v454_v18 = vadd.f32 %v453_v7, %v201_v2 }
  0x90   :  { %v944_v17 = vpop.permute.xlu2 %120  ;;  %v431_v28 = vadd.f32 %v430_v10, %v156_v8 }
  0x91   :  { %v500_v26 = vmax.f32 %v454_v18, 0.0 }
  0x92   :  { %v491_v35 = vmax.f32 %v431_v28, 0.0 }
  0x94   :  { %v516_v42 = vpack.c.bf16 %v491_v35, %v490_v34 }
  0x95   :  { %v940_v12 = vpop.permute.xlu1 %145 }
  0x96   :  { %v455_v13 = vpop.f32.mrf.mxu3  ;;  %v942_v14 = vpop.permute.xlu0 %140 }
  0x97   :  { %v403_v15 = vpop.f32.mrf.mxu0  ;;  %v433_v16 = vpop.f32.mrf.mxu1 }
  0x98   :  { %v434_v19 = vadd.f32 %v433_v16, %v161_v57  ;;  %v952_v36 = vpop.permute.xlu2 %185 }
  0x9a   :  { %v492_v29 = vmax.f32 %v434_v19, 0.0 }
  0x9d   :  { %v946_v20 = vpop.permute.xlu1 %130 }
  0x9e   :  { %v948_v21 = vpop.f32.mrf.mxu3  ;;  %v206_v22 = vpop.permute.xlu0 %205 }
  0x9f   :  { %v456_v23 = vadd.f32 %v455_v13, %v206_v22  ;;  %v405_v24 = vpop.f32.mrf.mxu0  ;;  %v435_v27 = vpop.f32.mrf.mxu1 }
  0xa0   :  { %v436_v31 = vadd.f32 %v435_v27, %v166_v58  ;;  %v964_v46 = vpop.permute.xlu2 %170 }
  0xa1   :  { %v501_v30 = vmax.f32 %v456_v23, 0.0 }
  0xa2   :  { %v493_v32 = vmax.f32 %v436_v31, 0.0 }
  0xa3   :  { %v950_v33 = vpack.c.bf16 %v501_v30, %v500_v26 }
  0xa4   :  { %v517_v38 = vpack.c.bf16 %v493_v32, %v492_v29  ;;  %v526_v29 = vld [vmem:[%s1028_s3] sm:$0xf]  ;;  %s720_s3 = smov [#allocation2]  }
  0xa5   :  { %v954_v37 = vpop.permute.xlu1 %195  ;;  %534 = vst [vmem:[#allocation1] ss:$4 sm:$0xff] %v526_v29  ;;  %s572_s4 = sshll.u32 %s720_s3, 4  ;;  %s573_s4 = int_to_ptr.vmem [resolvable:$true] %s572_s4 }
  0xa6   :  { %v460_v39 = vpop.f32.mrf.mxu3  ;;  %v956_v40 = vpop.permute.xlu0 %190  ;;  %539 = vmatpush.bf16.msrb.mxu1 %v517_v38 }
  0xa7   :  { %v958_v41 = vpop.f32.mrf.mxu0  ;;  %v968_v48 = vpop.f32.mrf.mxu1 }
  0xa8   :  { %v106_v53 = vpop.permute.xlu2 %105 }
  0xa9   :  { %v406_v55 = vadd.f32 %v405_v24, %v106_v53 }
  0xaa   :  { %540 = vmatpush.bf16.msrb.mxu1 %v516_v42 }
  0xab   :  { %v481_v5 = vmax.f32 %v406_v55, 0.0 }
  0xad   :  { %v960_v43 = vpop.permute.xlu1 %180 }
  0xae   :  { %v463_v44 = vpop.f32.mrf.mxu3  ;;  %v962_v45 = vpop.permute.xlu0 %125 }
  0xaf   :  { %v966_v47 = vpop.f32.mrf.mxu0  ;;  %v976_v54 = vpop.f32.mrf.mxu1 }
  0xb5   :  { %v970_v49 = vpop.permute.xlu1 %115 }
  0xb6   :  { %v465_v50 = vpop.f32.mrf.mxu3  ;;  %v972_v51 = vpop.permute.xlu0 %110 }
  0xb7   :  { %v974_v52 = vpop.f32.mrf.mxu0  ;;  %v982_v10 = vpop.f32.mrf.mxu1  ;;  %v466_v53 = vadd.f32 %v465_v50, %v930_v1  ;;  %v459_v1 = vadd.f32 %v948_v21, %v936_v6 }
  0xbd   :  { %v101_v56 = vpop.permute.xlu1 %100 }
  0xbe   :  { %v468_v57 = vpop.f32.mrf.mxu3  ;;  %v978_v58 = vpop.permute.xlu0 %175  ;;  %v404_v59 = vadd.f32 %v403_v15, %v101_v56 }
  0xbf   :  { %v415_v2 = vpop.f32.mrf.mxu0  ;;  %v445_v28 = vpop.f32.mrf.mxu1  ;;  %v469_v34 = vadd.f32 %v468_v57, %v920_v60 }
  0xc0   :  { %v480_v7 = vmax.f32 %v404_v59, 0.0  ;;  %v464_v59 = vadd.f32 %v463_v44, %v932_v3 }
  0xc2   :  { %v980_v8 = vpack.c.bf16 %v481_v5, %v480_v7  ;;  %v506_v5 = vmax.f32 %v469_v34, 0.0  ;;  %v505_v7 = vmax.f32 %v466_v53, 0.0  ;;  %v504_v50 = vmax.f32 %v464_v59, 0.0 }
  0xc5   :  { %v96_v13 = vpop.permute.xlu1 %95 }
  0xc6   :  { %v470_v16 = vpop.f32.mrf.mxu3  ;;  %v401_v18 = vadd.f32 %v400_v9, %v96_v13  ;;  %v91_v19 = vpop.permute.xlu0 %90 }
  0xc7   :  { %v399_v22 = vadd.f32 %v934_v4, %v91_v19  ;;  %v418_v23 = vpop.f32.mrf.mxu0  ;;  %v471_v9 = vadd.f32 %v470_v16, %v926_v63  ;;  %v448_v42 = vpop.f32.mrf.mxu1  ;;  %v461_v63 = vadd.f32 %v460_v39, %v924_v62  ;;  %v416_v62 = vadd.f32 %v415_v2, %v962_v45 }
  0xc8   :  { %v479_v24 = vmax.f32 %v401_v18, 0.0  ;;  %v419_v3 = vadd.f32 %v418_v23, %v946_v20  ;;  %v411_v20 = vadd.f32 %v966_v47, %v970_v49  ;;  %v409_v23 = vadd.f32 %v958_v41, %v972_v51 }
  0xc9   :  { %v478_v25 = vmax.f32 %v399_v22, 0.0  ;;  %v507_v55 = vmax.f32 %v471_v9, 0.0  ;;  %v503_v18 = vmax.f32 %v461_v63, 0.0  ;;  %v485_v45 = vmax.f32 %v416_v62, 0.0 }
  0xca   :  { %v482_v29 = vmax.f32 %v409_v23, 0.0  ;;  %v441_v41 = vadd.f32 %v976_v54, %v978_v58  ;;  %v535_v54 = vld.sshfl [vmem:[#allocation1] sm:$0xff pattern:$0x73625140] }
  0xcb   :  { %v985_v26 = vpack.c.bf16 %v479_v24, %v478_v25  ;;  %v524_v13 = vpack.c.bf16 %v507_v55, %v506_v5  ;;  %v502_v24 = vmax.f32 %v459_v1, 0.0  ;;  %v449_v25 = vadd.f32 %v448_v42, %v956_v40 }
  0xcd   :  { %v522_v21 = vpack.c.bf16 %v503_v18, %v502_v24  ;;  %v498_v47 = vmax.f32 %v449_v25, 0.0 }
  0xce   :  { %v473_v27 = vpop.f32.mrf.mxu3 }
  0xcf   :  { %v420_v15 = vpop.f32.mrf.mxu0  ;;  %v474_v30 = vadd.f32 %v473_v27, %v922_v61  ;;  %v450_v19 = vpop.f32.mrf.mxu1 }
  0xd0   :  { %v421_v60 = vadd.f32 %v420_v15, %v938_v11  ;;  %v414_v11 = vadd.f32 %v974_v52, %v944_v17  ;;  %v451_v6 = vadd.f32 %v450_v19, %v954_v37  ;;  %v446_v17 = vadd.f32 %v445_v28, %v952_v36 }
  0xd1   :  { %v508_v35 = vmax.f32 %v474_v30, 0.0  ;;  %v483_v15 = vmax.f32 %v411_v20, 0.0  ;;  %v444_v30 = vadd.f32 %v982_v10, %v960_v43  ;;  %v439_v36 = vadd.f32 %v968_v48, %v964_v46  ;;  %v536_v43 = vld.sshfl [vmem:[#allocation1 + $0x8] sm:$0xff pattern:$0x73625140]  ;;  %v531_v10 = vpop.permute.xlu2 %530 }
  0xd2   :  { %v487_v39 = vmax.f32 %v421_v60, 0.0  ;;  %v484_v27 = vmax.f32 %v414_v11, 0.0  ;;  %v499_v52 = vmax.f32 %v451_v6, 0.0  ;;  %v497_v40 = vmax.f32 %v446_v17, 0.0 }
  0xd3   :  { %v512_v51 = vpack.c.bf16 %v483_v15, %v482_v29  ;;  %v496_v28 = vmax.f32 %v444_v30, 0.0 }
  0xd4   :  { %v513_v37 = vpack.c.bf16 %v485_v45, %v484_v27  ;;  %v520_v49 = vpack.c.bf16 %v499_v52, %v498_v47 }
  0xd5   :  { %v519_v9 = vpack.c.bf16 %v497_v40, %v496_v28 }
  0xd6   :  { %v475_v31 = vpop.f32.mrf.mxu3 }
  0xd7   :  { %v476_v4 = vadd.f32 %v475_v31, %v928_v0  ;;  %v423_v32 = vpop.f32.mrf.mxu0  ;;  %v495_v31 = vmax.f32 %v441_v41, 0.0 }
  0xd8   :  { %v424_v61 = vadd.f32 %v423_v32, %v942_v14  ;;  %v523_v14 = vpack.c.bf16 %v505_v7, %v504_v50 }
  0xd9   :  { %v509_v38 = vmax.f32 %v476_v4, 0.0  ;;  %v494_v4 = vmax.f32 %v439_v36, 0.0 }
  0xda   :  { %v488_v44 = vmax.f32 %v424_v61, 0.0 }
  0xdb   :  { %v525_v56 = vpack.c.bf16 %v509_v38, %v508_v35 }
  0xdd   :  { %552 = vmatpush.bf16.msra.mxu2 %v525_v56 }
  0xdf   :  { %v425_v0 = vpop.f32.mrf.mxu0 }
  0xe0   :  { %v426_v57 = vadd.f32 %v425_v0, %v940_v12  ;;  %v486_v12 = vmax.f32 %v419_v3, 0.0 }
  0xe1   :  { %553 = vmatpush.bf16.msra.mxu2 %v524_v13 }
  0xe2   :  { %v489_v16 = vmax.f32 %v426_v57, 0.0  ;;  %v514_v2 = vpack.c.bf16 %v487_v39, %v486_v12 }
  0xe4   :  { %v515_v22 = vpack.c.bf16 %v489_v16, %v488_v44 }
  0xe5   :  { %554 = vmatpush.bf16.msra.mxu2 %v523_v14 }
  0xe6   :  { %541 = vmatpush.bf16.msrb.mxu1 %v515_v22 }
  0xe9   :  { %555 = vmatpush.bf16.msra.mxu2 %v522_v21 }
  0xea   :  { %542 = vmatpush.bf16.msrb.mxu1 %v514_v2 }
  0xed   :  { %556 = vmatpush.bf16.msra.mxu2 %v950_v33  ;;  %v518_v33 = vpack.c.bf16 %v495_v31, %v494_v4 }
  0xee   :  { %543 = vmatpush.bf16.msrb.mxu1 %v513_v37 }
  0xf1   :  { %557 = vmatpush.bf16.msra.mxu2 %v520_v49 }
  0xf2   :  { %544 = vmatpush.bf16.msrb.mxu1 %v512_v51 }
  0xf5   :  { %558 = vmatpush.bf16.msra.mxu2 %v519_v9 }
  0xf6   :  { %545 = vmatpush.bf16.msrb.mxu1 %v980_v8 }
  0xf9   :  { %559 = vmatpush.bf16.msra.mxu2 %v518_v33 }
  0xfa   :  { %546 = vmatpush.bf16.msrb.mxu1 %v985_v26 }
  0xfc   :  { %560 = vmatmul.bf16.vlgmr.msra.gmra.mxu2 %v536_v43 }
  0xfd   :  { %547 = vmatmul.bf16.vlgmr.msrb.gmra.mxu1 %v535_v54 }
 0x17a   :  { %v548_v58 = vpop.f32.mrf.mxu1 }
 0x17b   :  { %v549_v46 = vadd.f32 %v548_v58, %v531_v10 }
 0x17f   :  { %v561_v48 = vpop.f32.mrf.mxu2 }
 0x180   :  { %v562_v8 = vadd.f32 %v561_v48, %v549_v46 }
 0x182   :  { %566 = vst.msk [vmem:[#allocation2] sm:$0x7] %vm565_vm3, %v562_v8  ;;  %v550_v32 = vpop.f32.mrf.mxu1 }
 0x183   :  { %577 = dma.vmem_to_hbm [thread:$0]  %s573_s4, 64, %s575_s18, [#allocation3]  }
 0x187   :  { %v563_v26 = vpop.f32.mrf.mxu2 }
 0x188   :  { %716 = dma.done.wait [#allocation3], 64  }
 0x189   :  { %717 = vsyncadd [#allocation3], 4294967232 }
 0x18a   :  { %582 = vsyncpa [#allocation3], 1 }

</bundles_post_ra>
